<compile_context>
chip_gen: v7x
topology: tpu7x:2x2x1
jax: 0.10.0
libtpu: 0.0.40
codegen_flags: <defaults>
</compile_context>

<pallas_src>
import functools
import math

import jax
import jax.numpy as jnp
from jax.experimental import pallas as pl
from jax.experimental.pallas import tpu as pltpu


def make_positional_encoding_buffer(max_len, d_model, dtype=jnp.float32):
    """The `pe` buffer the PyTorch module registers, stored as [max_len, d_model].

    (PyTorch keeps it as [max_len, 1, d_model]; the batch broadcast is done
    inside the kernel instead, so we keep the dense 2-D layout and cast to the
    model dtype once here.)
    """
    position = jnp.arange(max_len, dtype=jnp.float32)[:, None]
    div_term = jnp.exp(jnp.arange(0, d_model, 2, dtype=jnp.float32)
                       * (-math.log(10000.0) / d_model))
    pe = jnp.zeros((max_len, d_model), jnp.float32)
    pe = pe.at[:, 0::2].set(jnp.sin(position * div_term))
    pe = pe.at[:, 1::2].set(jnp.cos(position * div_term))
    return pe.astype(dtype)                      # [max_len, d_model]


def _pos_enc_kernel(x_ref, pe_ref, o_ref, *, batch):
    # x_ref : [tile_s, B*D]   pe_ref : [tile_s, D]   o_ref : [tile_s, B*D]
    pe_b = jnp.tile(pe_ref[...], (1, batch))     # broadcast PE row across batch
    o_ref[...] = x_ref[...] + pe_b.astype(x_ref.dtype)


def positional_encoding_forward(x, pe, *, tile_s=None, target_block_bytes=2 << 20):
    """x: [S, B, D] (seq-major, like the PyTorch module); pe: [max_len, D].

    Returns x + pe[:S] broadcast over batch, with eval-mode (identity) dropout.
    """
    S, B, D = x.shape
    max_len, pe_d = pe.shape
    assert pe_d == D, f"pe d_model {pe_d} != x d_model {D}"
    assert S <= max_len, f"sequence length {S} exceeds pe max_len {max_len}"

    # Flatten to a sublane/lane-dense 2-D view: [S, B*D].  Free (contiguous).
    x2 = x.reshape(S, B * D)
    row_bytes = B * D * x.dtype.itemsize

    if tile_s is None:
        tile_s = max(1, target_block_bytes // row_bytes)
    if tile_s >= S:
        tile_s = S                               # single block, grid=(1,)
    else:
        tile_s = max(8, (tile_s // 8) * 8)       # keep sublane multiple of 8

    # pe BlockSpec must satisfy the (8,128) rule: tile_s % 8 == 0, or the
    # block must span pe's full first dim.  Rare ragged-S single-block case
    # falls back to a one-time S-row slice so the block equals full dims.
    if tile_s % 8 == 0:
        pe_arg = pe                              # full buffer; index_map picks rows
    else:
        pe_arg = pe[:S]

    grid = (pl.cdiv(S, tile_s),)

    out2 = pl.pallas_call(
        functools.partial(_pos_enc_kernel, batch=B),
        out_shape=jax.ShapeDtypeStruct((S, B * D), x.dtype),
        grid=grid,
        in_specs=[
            pl.BlockSpec((tile_s, B * D), lambda i: (i, 0)),
            pl.BlockSpec((tile_s, D), lambda i: (i, 0)),
        ],
        out_specs=pl.BlockSpec((tile_s, B * D), lambda i: (i, 0)),
        compiler_params=pltpu.CompilerParams(
            dimension_semantics=("parallel",)),  # v7x: two TCs split large-S work
    )(x2, pe_arg)

    return out2.reshape(S, B, D)


if __name__ == "__main__":
    # Shapes consistent with how the module is used in the transformer:
    # seq=16, batch=2, embed dim d_model=128 (lane-dense), max_len=2000.
    S, B, D = 16, 2, 128
    MAX_LEN = 2000

    key = jax.random.PRNGKey(0)
    x = jax.random.normal(key, (S, B, D), jnp.float32)

    pe = make_positional_encoding_buffer(MAX_LEN, D)          # [max_len, D]

    out = positional_encoding_forward(x, pe)                  # grid = (1,)
    jax.block_until_ready(out)

    # Reference: exactly the PyTorch forward (eval mode, dropout = identity).
    ref = x + pe[:S][:, None, :]

    assert out.shape == (S, B, D)
    assert bool(jnp.all(jnp.isfinite(out)))
    assert bool(jnp.allclose(out, ref, atol=1e-6, rtol=1e-6))
    print("KERNEL_OK")
</pallas_src>

<mosaic_0001>
module attributes {stable_mosaic.version = 11 : i64} {
  func.func @_pos_enc_kernel(%arg0: i32, %arg1: memref<16x256xf32, #tpu.memory_space<vmem>>, %arg2: memref<16x128xf32, #tpu.memory_space<vmem>>, %arg3: memref<16x256xf32, #tpu.memory_space<vmem>>) attributes {dimension_semantics = [#tpu.dimension_semantics<parallel>], iteration_bounds = array<i64: 1>, scalar_prefetch = 0 : i64, scratch_operands = 0 : i64, tpu.core_type = #tpu.core_type<tc>, window_params = [{transform_indices = @transform_0, window_bounds = array<i64: 16, 256>}, {transform_indices = @transform_1, window_bounds = array<i64: 16, 128>}, {transform_indices = @transform_2, window_bounds = array<i64: 16, 256>}]} {
    %c0 = arith.constant 0 : index
    %c0_0 = arith.constant 0 : index
    %0 = vector.load %arg2[%c0, %c0_0] : memref<16x128xf32, #tpu.memory_space<vmem>>, vector<16x128xf32>
    %1 = tpu.concatenate %0, %0 in 1 : vector<16x128xf32>, vector<16x128xf32> -> vector<16x256xf32>
    %c0_1 = arith.constant 0 : index
    %c0_2 = arith.constant 0 : index
    %2 = vector.load %arg1[%c0_1, %c0_2] : memref<16x256xf32, #tpu.memory_space<vmem>>, vector<16x256xf32>
    %3 = arith.addf %2, %1 : vector<16x256xf32>
    %c0_3 = arith.constant 0 : index
    %c0_4 = arith.constant 0 : index
    %4 = vector.load %arg3[%c0_3, %c0_4] : memref<16x256xf32, #tpu.memory_space<vmem>>, vector<16x256xf32>
    tpu.vector_store %arg3[%c0_3, %c0_4], %3 {strides = array<i32>} : memref<16x256xf32, #tpu.memory_space<vmem>>, vector<16x256xf32>,
    return
  }
  func.func @transform_0(%arg0: i32) -> (i32, i32) {
    %c0_i32 = arith.constant 0 : i32
    %c0_i32_0 = arith.constant 0 : i32
    return %arg0, %c0_i32 : i32, i32
  }
  func.func @transform_1(%arg0: i32) -> (i32, i32) {
    %c0_i32 = arith.constant 0 : i32
    %c0_i32_0 = arith.constant 0 : i32
    return %arg0, %c0_i32 : i32, i32
  }
  func.func @transform_2(%arg0: i32) -> (i32, i32) {
    %c0_i32 = arith.constant 0 : i32
    %c0_i32_0 = arith.constant 0 : i32
    return %arg0, %c0_i32 : i32, i32
  }
}

</mosaic_0001>

<bundles_post_ra>
// kernel: tpu_custom_call.1
= control target key start
LH: loop header
LB: loop body
LE: loop exit
PB: predicated region body
PF: predicated region fallthrough
CT: control target
= control target key end

     0   :  { %7 = vsyncpa [#allocation3], 0  ;;  %s218_s0 = inlined_call_operand.hbm [shape: f32[16,256], index: 0, kind: input, shape index: {}]   ;;  %s219_s1 = inlined_call_operand.hbm [shape: f32[2000,128], index: 1, kind: input, shape index: {}]   ;;  %s220_s2 = inlined_call_operand.hbm [shape: f32[16,256], index: 2, kind: output, shape index: {}]  }
   0x1   :  { %8 = vsyncpa [#allocation6], 0 }
   0x2   :  { %9 = vsyncpa [#allocation4], 0  ;;  %s151_s9 = smov [#allocation2]   ;;  %s79_s13 = scalar_lea.hbm %s218_s0, 512 }
   0x3   :  { %s15_s10 = sshll.u32 %s151_s9, 4  ;;  %p80_p0 = scmp.ne.s32.totalorder %s218_s0, %s79_s13  ;;  %s16_s10 = int_to_ptr.vmem [resolvable:$true] %s15_s10 }
   0x4   :  { %p83_p1 = scmp.lt.u32.totalorder %s79_s13, %s218_s0 }
   0x6   :  { %p85_p2 = pnand %p83_p1, %p80_p0 }
   0x8   :  { %88 = shalt.err (!%p85_p2)
}
   0x9   :  { %s89_s18 = scalar_lea.vmem %s16_s10, 512  ;;  %p94_p4 = scmp.lt.s32.totalorder %s16_s10, %s16_s10 }
   0xa   :  { %p90_p3 = scmp.ne.s32.totalorder %s16_s10, %s89_s18  ;;  %p95_p5 = scmp.lt.s32.totalorder %s89_s18, %s89_s18 }
   0xc   :  { %p96_p6 = por %p95_p5, %p94_p4 }
   0xe   :  { %p97_p7 = pnand %p96_p6, %p90_p3 }
  0x10   :  { %100 = shalt.err (!%p97_p7)
}
  0x11   :  { %s152_s19 = smov 256   ;;  %s153_s20 = smov 16  }
  0x12   :  { %21 = dma.hbm_to_vmem [thread:$0]  %s218_s0, 512, %s16_s10, [#allocation3], %s152_s19, %s152_s19, %s153_s20  }
  0x13   :  { %s154_s23 = smov [#allocation5]   ;;  %s101_s27 = scalar_lea.hbm %s219_s1, 256 }
  0x14   :  { %s27_s24 = sshll.u32 %s154_s23, 4  ;;  %p102_p8 = scmp.ne.s32.totalorder %s219_s1, %s101_s27  ;;  %s28_s24 = int_to_ptr.vmem [resolvable:$true] %s27_s24 }
  0x15   :  { %s103_s4 = scalar_lea.hbm %s219_s1, 32000  ;;  %p105_p10 = scmp.lt.u32.totalorder %s101_s27, %s219_s1 }
  0x16   :  { %p104_p9 = scmp.lt.u32.totalorder %s103_s4, %s101_s27 }
  0x18   :  { %p106_p11 = por %p105_p10, %p104_p9 }
  0x1a   :  { %p107_p12 = pnand %p106_p11, %p102_p8 }
  0x1c   :  { %110 = shalt.err (!%p107_p12)
}
  0x1d   :  { %s111_s0 = scalar_lea.vmem %s28_s24, 256  ;;  %p116_p0 = scmp.lt.s32.totalorder %s28_s24, %s28_s24 }
  0x1e   :  { %p112_p13 = scmp.ne.s32.totalorder %s28_s24, %s111_s0  ;;  %p117_p1 = scmp.lt.s32.totalorder %s111_s0, %s111_s0 }
  0x20   :  { %p118_p2 = por %p117_p1, %p116_p0 }
  0x22   :  { %p119_p3 = pnand %p118_p2, %p112_p13 }
  0x24   :  { %122 = shalt.err (!%p119_p3)
}
  0x25   :  { %s155_s7 = smov 128   ;;  %s156_s8 = smov 8  }
  0x26   :  { %33 = dma.hbm_to_vmem [thread:$0]  %s219_s1, 256, %s28_s24, [#allocation6], %s155_s7, %s155_s7, %s156_s8  }
  0x27   :  { %145 = dma.done.wait [#allocation3], 512  }
  0x28   :  { %146 = vsyncadd [#allocation3], 4294966784 }
  0x29   :  { %147 = dma.done.wait [#allocation6], 256  }
  0x2a   :  { %148 = vsyncadd [#allocation6], 4294967040  ;;  %s157_s11 = smov [#allocation7]   ;;  %v40_v0 = vld [vmem:[#allocation5] sm:$0xff]  ;;  %v43_v2 = vld [vmem:[#allocation2 + $0x8] sm:$0xff] }
  0x2b   :  { %s59_s12 = sshll.u32 %s157_s11, 4  ;;  %v42_v1 = vld [vmem:[#allocation2] sm:$0xff]  ;;  %v47_v4 = vadd.f32 %v43_v2, %v40_v0  ;;  %v41_v5 = vld [vmem:[#allocation5 + $0x8] sm:$0xff]  ;;  %v44_v6 = vld [vmem:[#allocation2 + $0x10] sm:$0xff]  ;;  %s60_s12 = int_to_ptr.vmem [resolvable:$true] %s59_s12 }
  0x2c   :  { %v46_v3 = vadd.f32 %v42_v1, %v40_v0  ;;  %v45_v7 = vld [vmem:[#allocation2 + $0x18] sm:$0xff]  ;;  %v48_v8 = vadd.f32 %v44_v6, %v41_v5  ;;  %s123_s1 = scalar_lea.vmem %s60_s12, 512  ;;  %p128_p5 = scmp.lt.s32.totalorder %s60_s12, %s60_s12 }
  0x2d   :  { %v49_v9 = vadd.f32 %v45_v7, %v41_v5  ;;  %51 = vst [vmem:[#allocation7 + $0x8] sm:$0xff] %v47_v4  ;;  %p124_p4 = scmp.ne.s32.totalorder %s60_s12, %s123_s1  ;;  %p129_p6 = scmp.lt.s32.totalorder %s123_s1, %s123_s1 }
  0x2e   :  { %50 = vst [vmem:[#allocation7] sm:$0xff] %v46_v3  ;;  %52 = vst [vmem:[#allocation7 + $0x10] sm:$0xff] %v48_v8 }
  0x2f   :  { %53 = vst [vmem:[#allocation7 + $0x18] sm:$0xff] %v49_v9  ;;  %p130_p7 = por %p129_p6, %p128_p5 }
  0x31   :  { %p131_p8 = pnand %p130_p7, %p124_p4 }
  0x33   :  { %134 = shalt.err (!%p131_p8)
}
  0x34   :  { %s135_s15 = scalar_lea.hbm %s220_s2, 512 }
  0x35   :  { %p136_p9 = scmp.ne.s32.totalorder %s220_s2, %s135_s15  ;;  %p139_p10 = scmp.lt.u32.totalorder %s135_s15, %s220_s2 }
  0x37   :  { %p141_p11 = pnand %p139_p10, %p136_p9 }
  0x39   :  { %144 = shalt.err (!%p141_p11)
}
  0x3a   :  { %65 = dma.vmem_to_hbm [thread:$0]  %s60_s12, 512, %s220_s2, [#allocation4], %s152_s19, %s152_s19, %s153_s20  }
  0x3b   :  { %149 = dma.done.wait [#allocation4], 512  }
  0x3c   :  { %150 = vsyncadd [#allocation4], 4294966784 }
  0x3d   :  { %69 = vsyncpa [#allocation3], 1 }
  0x3e   :  { %70 = vsyncpa [#allocation6], 1 }
  0x3f   :  { %71 = vsyncpa [#allocation4], 1 }

</bundles_post_ra>
